<compile_context>
chip_gen: v6e
topology: v6e:2x2x1
jax: 0.10.0
libtpu: 0.0.40
codegen_flags: <defaults>
</compile_context>

<pallas_src>
import jax
import jax.numpy as jnp
from jax.experimental import pallas as pl
from jax.experimental.pallas import tpu as pltpu

EPS = 1e-8

# --- model dimensions (cardekho dataset: 4 categorical cols, 3 continuous,
#     embedding_dim = 2) --------------------------------------------------------
VOCAB_SIZES = (5, 7, 3, 6)
N_TABLES = len(VOCAB_SIZES)
EMB_DIM = 2
N_CONT = 3
N_EMB = EMB_DIM * N_TABLES            # 8
IN_FEATS = N_CONT + N_EMB             # 11
H1, H2, OUT = 16, 8, 1
V_TOT = sum(VOCAB_SIZES)              # 21
_off, _acc = [], 0
for _v in VOCAB_SIZES:
    _off.append(_acc)
    _acc += _v
V_OFF = tuple(_off)                   # (0, 5, 12, 15)

IN_W = 32                             # merged-input / layer-1 activation lane width
BIAS_LANE = N_CONT + V_TOT            # 24 : the "ones" lane that carries b1
CLS_SHIFT = tuple(N_CONT + o for o in V_OFF)   # (3, 8, 15, 18)

# --- packed parameter slab layout: one (64, 32) f32 array ----------------------
P_W = 32
R_W1 = 0        # rows [ 0,32) cols [0,16): fused layer-1 weights
                #   rows 0..2   = W1[:3,:]          (continuous features)
                #   rows 3..23  = blockdiag(emb) @ W1[3:,:]   (folded embeddings)
                #   row  24     = b1                (paired with the bias lane)
R_W2 = 32       # rows [32,48) cols [0, 8): W2 (16,8)
R_W3C = 48      # rows [48,56) col  0     : w3 stored as a COLUMN (8,1)
R_G1 = 56       # row 56 cols [0,16): gamma1
R_G2 = 57       # row 57 cols [0, 8): gamma2
R_B2 = 58       # row 58 cols [0, 8): b2
R_B3 = 59       # row 59 col 0      : b3
N_ROWS = 64     # sublane aligned


def pack_params(emb_tables, w1, b1, g1, w2, b2, g2, w3, b3):
    """Pack (and algebraically fold) all parameters into one (64, 32) slab.

    Runs once per parameter update, not per forward pass.
    """
    p = jnp.zeros((N_ROWS, P_W), jnp.float32)
    # fused layer-1 block
    p = p.at[R_W1:R_W1 + N_CONT, :H1].set(w1[:N_CONT, :])
    for j, tab in enumerate(emb_tables):
        r0 = R_W1 + N_CONT + V_OFF[j]
        wseg = w1[N_CONT + j * EMB_DIM:N_CONT + (j + 1) * EMB_DIM, :]  # (2,16)
        p = p.at[r0:r0 + tab.shape[0], :H1].set(tab @ wseg)            # fold emb into W1
    p = p.at[R_W1 + BIAS_LANE, :H1].set(b1.reshape(H1))                # fold b1
    # remaining layers
    p = p.at[R_W2:R_W2 + H1, :H2].set(w2)
    p = p.at[R_W3C:R_W3C + H2, 0:1].set(w3.reshape(H2, OUT))
    p = p.at[R_G1, :H1].set(g1.reshape(H1))
    p = p.at[R_G2, :H2].set(g2.reshape(H2))
    p = p.at[R_B2, :H2].set(b2.reshape(H2))
    p = p.at[R_B3, 0].set(b3.reshape(OUT)[0])
    return p


def fused_kernel(xin_ref, p_ref, out_ref):
    B = xin_ref.shape[0]
    inv_nm1 = 1.0 / (B - 1)          # compile-time constant; B >= 2 required

    xin = xin_ref[...]               # (B, 32) f32: lanes 0..2 = x, 3..6 = shifted class ids
    lanef = jax.lax.broadcasted_iota(jnp.int32, (B, IN_W), 1).astype(jnp.float32)

    # one-hot (class ids are already shifted by vocab offsets) + bias lane,
    # accumulated as bool, converted to f32 once
    hit = lanef == float(BIAS_LANE)
    for j in range(N_TABLES):
        hit = jnp.logical_or(hit, lanef == xin[:, N_CONT + j:N_CONT + j + 1])
    # a1 = [ x | one-hot(21) | 1 | zeros ]  (class-id lanes are overwritten)
    a1 = jnp.where(lanef < float(N_CONT), xin, hit.astype(jnp.float32))

    # custom BatchNorm: unbiased var (N-1), eps=1e-8, out = gamma*norm + x
    def bn(h, g):
        mean = jnp.mean(h, axis=0, keepdims=True)
        d = h - mean
        var = jnp.sum(d * d, axis=0, keepdims=True) * inv_nm1
        return h + d * (g * jax.lax.rsqrt(var + EPS))    # gamma folded, EUP rsqrt

    # ---- layer 1: continuous + embeddings + bias in a SINGLE matmul ----
    h1 = bn(jnp.dot(a1, p_ref[R_W1:R_W1 + IN_W, 0:H1],
                    preferred_element_type=jnp.float32),
            p_ref[R_G1:R_G1 + 1, 0:H1])

    # ---- layer 2: Linear(16,8) + BatchNorm(8) ----
    h2 = bn(jnp.dot(h1, p_ref[R_W2:R_W2 + H1, 0:H2],
                    preferred_element_type=jnp.float32)
            + p_ref[R_B2:R_B2 + 1, 0:H2],
            p_ref[R_G2:R_G2 + 1, 0:H2])

    # ---- layer 3: Linear(8,1) on VPU/XLU, lane-dense (1, B) store ----
    h2t = jnp.transpose(h2)                             # (H2, B)
    w3c = p_ref[R_W3C:R_W3C + H2, 0:1]                  # (H2, 1)
    b3 = p_ref[R_B3:R_B3 + 1, 0:1]                      # (1, 1)
    out_ref[...] = jnp.sum(h2t * w3c, axis=0, keepdims=True) + b3   # (1, B)


@jax.jit
def model_forward_pallas(x, x_classes, packed_params):
    """Whole forward (embedding gather + concat + MLP/BN) in one pallas_call."""
    B = x.shape[0]
    # merge both data inputs into ONE f32 slab (2 input DMAs total: data + params)
    shifted = x_classes.astype(jnp.float32) + jnp.asarray(CLS_SHIFT, jnp.float32)
    xin = jnp.zeros((B, IN_W), jnp.float32)
    xin = xin.at[:, 0:N_CONT].set(x)
    xin = xin.at[:, N_CONT:N_CONT + N_TABLES].set(shifted)

    vmem = pl.BlockSpec(memory_space=pltpu.MemorySpace.VMEM)
    out = pl.pallas_call(
        fused_kernel,
        out_shape=jax.ShapeDtypeStruct((1, B), jnp.float32),   # lane-dense output
        in_specs=[vmem, vmem],
        out_specs=vmem,
    )(xin, packed_params)
    return out.T   # (B, 1) to match the torch module's output shape
    # NOTE: out-of-range class indices map to a zero embedding here instead of
    # erroring like torch.nn.Embedding; validate inputs upstream.


def model_forward_ref(x, x_classes, emb_tables, params):
    """Plain-JAX reference mirroring the PyTorch Model/BatchNorm exactly."""
    (w1, b1, g1, w2, b2, g2, w3, b3) = params
    B = x.shape[0]
    x_emb = jnp.concatenate(
        [emb_tables[j][x_classes[:, j]] for j in range(N_TABLES)], axis=-1)
    x_cat = jnp.concatenate([x, x_emb], axis=-1)

    def bn(h, g):
        mean = jnp.mean(h, axis=0, keepdims=True)
        d = h - mean
        var = jnp.sum(d * d, axis=0, keepdims=True) / (B - 1)   # torch.var (unbiased)
        return g * (d / jnp.sqrt(var + EPS)) + h

    h1 = bn(x_cat @ w1 + b1, g1)
    h2 = bn(h1 @ w2 + b2, g2)
    return h2 @ w3 + b3


if __name__ == "__main__":
    key = jax.random.PRNGKey(0)
    keys = jax.random.split(key, 16)

    B = 8  # must be >= 2 (BatchNorm over the batch uses the N-1 divisor)

    # deterministic parameter init (shapes from Model.__init__)
    emb_tables = [jax.random.normal(keys[i], (v, EMB_DIM), jnp.float32)
                  for i, v in enumerate(VOCAB_SIZES)]
    w1 = jax.random.normal(keys[4], (IN_FEATS, H1), jnp.float32) * 0.3
    b1 = jax.random.normal(keys[5], (H1,), jnp.float32) * 0.1
    g1 = jax.random.uniform(keys[6], (H1,), jnp.float32)          # torch.rand gamma
    w2 = jax.random.normal(keys[7], (H1, H2), jnp.float32) * 0.3
    b2 = jax.random.normal(keys[8], (H2,), jnp.float32) * 0.1
    g2 = jax.random.uniform(keys[9], (H2,), jnp.float32)
    w3 = jax.random.normal(keys[10], (H2, OUT), jnp.float32) * 0.3
    b3 = jax.random.normal(keys[11], (OUT,), jnp.float32) * 0.1
    params = (w1, b1, g1, w2, b2, g2, w3, b3)

    # pack + fold everything once (outside the per-step forward path)
    packed = pack_params(emb_tables, *params)

    # inputs
    x = jax.random.normal(keys[12], (B, N_CONT), jnp.float32)
    x_classes = jnp.stack(
        [jax.random.randint(jax.random.fold_in(keys[13], i), (B,), 0, v)
         for i, v in enumerate(VOCAB_SIZES)],
        axis=1,
    ).astype(jnp.int32)                                           # (B, 4)

    y = jax.block_until_ready(model_forward_pallas(x, x_classes, packed))
    y_ref = model_forward_ref(x, x_classes, emb_tables, params)

    assert y.shape == (B, OUT)
    assert jnp.allclose(y, y_ref, atol=1e-4, rtol=1e-4)
    print("KERNEL_OK")
</pallas_src>

<mosaic_0001>
module attributes {stable_mosaic.version = 11 : i64} {
  func.func @fused_kernel(%arg0: memref<8x32xf32, #tpu.memory_space<vmem>>, %arg1: memref<64x32xf32, #tpu.memory_space<vmem>>, %arg2: memref<1x8xf32, #tpu.memory_space<vmem>>) attributes {dimension_semantics = [], scalar_prefetch = 0 : i64, scratch_operands = 0 : i64, tpu.core_type = #tpu.core_type<tc>} {
    %c0 = arith.constant 0 : index
    %c0_0 = arith.constant 0 : index
    %0 = vector.load %arg0[%c0, %c0_0] : memref<8x32xf32, #tpu.memory_space<vmem>>, vector<8x32xf32>
    %1 = tpu.iota {dimensions = array<i32: 1>} : vector<8x32xi32>
    %2 = arith.sitofp %1 : vector<8x32xi32> to vector<8x32xf32>
    %cst = arith.constant 2.400000e+01 : f32
    %3 = vector.broadcast %cst : f32 to vector<8x32xf32>
    %4 = arith.cmpf oeq, %2, %3 : vector<8x32xf32>
    %5 = vector.extract_strided_slice %0 {offsets = [0, 3], sizes = [8, 1], strides = [1, 1]} : vector<8x32xf32> to vector<8x1xf32>
    %6 = vector.broadcast %5 : vector<8x1xf32> to vector<8x32xf32>
    %7 = arith.cmpf oeq, %2, %6 : vector<8x32xf32>
    %8 = arith.ori %4, %7 : vector<8x32xi1>
    %9 = vector.extract_strided_slice %0 {offsets = [0, 4], sizes = [8, 1], strides = [1, 1]} : vector<8x32xf32> to vector<8x1xf32>
    %10 = vector.broadcast %9 : vector<8x1xf32> to vector<8x32xf32>
    %11 = arith.cmpf oeq, %2, %10 : vector<8x32xf32>
    %12 = arith.ori %8, %11 : vector<8x32xi1>
    %13 = vector.extract_strided_slice %0 {offsets = [0, 5], sizes = [8, 1], strides = [1, 1]} : vector<8x32xf32> to vector<8x1xf32>
    %14 = vector.broadcast %13 : vector<8x1xf32> to vector<8x32xf32>
    %15 = arith.cmpf oeq, %2, %14 : vector<8x32xf32>
    %16 = arith.ori %12, %15 : vector<8x32xi1>
    %17 = vector.extract_strided_slice %0 {offsets = [0, 6], sizes = [8, 1], strides = [1, 1]} : vector<8x32xf32> to vector<8x1xf32>
    %18 = vector.broadcast %17 : vector<8x1xf32> to vector<8x32xf32>
    %19 = arith.cmpf oeq, %2, %18 : vector<8x32xf32>
    %20 = arith.ori %16, %19 : vector<8x32xi1>
    %cst_1 = arith.constant 3.000000e+00 : f32
    %21 = vector.broadcast %cst_1 : f32 to vector<8x32xf32>
    %22 = arith.cmpf olt, %2, %21 : vector<8x32xf32>
    %23 = arith.extui %20 : vector<8x32xi1> to vector<8x32xi32>
    %24 = arith.sitofp %23 : vector<8x32xi32> to vector<8x32xf32>
    %25 = arith.select %22, %0, %24 : vector<8x32xi1>, vector<8x32xf32>
    %c0_2 = arith.constant 0 : index
    %c0_3 = arith.constant 0 : index
    %26 = vector.load %arg1[%c0_2, %c0_3] : memref<64x32xf32, #tpu.memory_space<vmem>>, vector<32x16xf32>
    %cst_4 = arith.constant dense<0.000000e+00> : vector<8x16xf32>
    %27 = tpu.matmul %25, %26, %cst_4 {dimension_numbers = #tpu.dot_dimension_numbers<[1], [0], [0], [1], [0, 0, 1, 1], [], []>} : vector<8x32xf32>, vector<32x16xf32>, vector<8x16xf32> -> vector<8x16xf32>
    %c56 = arith.constant 56 : index
    %c0_5 = arith.constant 0 : index
    %28 = vector.load %arg1[%c56, %c0_5] : memref<64x32xf32, #tpu.memory_space<vmem>>, vector<1x16xf32>
    %cst_6 = arith.constant dense<0.000000e+00> : vector<16xf32>
    %29 = vector.multi_reduction <add>, %27, %cst_6 [0] : vector<8x16xf32> to vector<16xf32>
    %30 = vector.shape_cast %29 : vector<16xf32> to vector<1x16xf32>
    %cst_7 = arith.constant 8.000000e+00 : f32
    %31 = vector.broadcast %cst_7 : f32 to vector<1x16xf32>
    %32 = arith.divf %30, %31 : vector<1x16xf32>
    %33 = vector.broadcast %32 : vector<1x16xf32> to vector<8x16xf32>
    %34 = arith.subf %27, %33 : vector<8x16xf32>
    %35 = arith.mulf %34, %34 : vector<8x16xf32>
    %cst_8 = arith.constant dense<0.000000e+00> : vector<16xf32>
    %36 = vector.multi_reduction <add>, %35, %cst_8 [0] : vector<8x16xf32> to vector<16xf32>
    %37 = vector.shape_cast %36 : vector<16xf32> to vector<1x16xf32>
    %cst_9 = arith.constant 0.142857149 : f32
    %38 = vector.broadcast %cst_9 : f32 to vector<1x16xf32>
    %39 = arith.mulf %37, %38 : vector<1x16xf32>
    %cst_10 = arith.constant 9.99999993E-9 : f32
    %40 = vector.broadcast %cst_10 : f32 to vector<1x16xf32>
    %41 = arith.addf %39, %40 : vector<1x16xf32>
    %42 = math.rsqrt %41 : vector<1x16xf32>
    %43 = arith.mulf %28, %42 : vector<1x16xf32>
    %44 = vector.broadcast %43 : vector<1x16xf32> to vector<8x16xf32>
    %45 = arith.mulf %34, %44 : vector<8x16xf32>
    %46 = arith.addf %27, %45 : vector<8x16xf32>
    %c32 = arith.constant 32 : index
    %c0_11 = arith.constant 0 : index
    %47 = vector.load %arg1[%c32, %c0_11] : memref<64x32xf32, #tpu.memory_space<vmem>>, vector<16x8xf32>
    %cst_12 = arith.constant dense<0.000000e+00> : vector<8x8xf32>
    %48 = tpu.matmul %46, %47, %cst_12 {dimension_numbers = #tpu.dot_dimension_numbers<[1], [0], [0], [1], [0, 0, 1, 1], [], []>} : vector<8x16xf32>, vector<16x8xf32>, vector<8x8xf32> -> vector<8x8xf32>
    %c58 = arith.constant 58 : index
    %c0_13 = arith.constant 0 : index
    %49 = vector.load %arg1[%c58, %c0_13] : memref<64x32xf32, #tpu.memory_space<vmem>>, vector<1x8xf32>
    %50 = vector.broadcast %49 : vector<1x8xf32> to vector<8x8xf32>
    %51 = arith.addf %48, %50 : vector<8x8xf32>
    %c57 = arith.constant 57 : index
    %c0_14 = arith.constant 0 : index
    %52 = vector.load %arg1[%c57, %c0_14] : memref<64x32xf32, #tpu.memory_space<vmem>>, vector<1x8xf32>
    %cst_15 = arith.constant dense<0.000000e+00> : vector<8xf32>
    %53 = vector.multi_reduction <add>, %51, %cst_15 [0] : vector<8x8xf32> to vector<8xf32>
    %54 = vector.shape_cast %53 : vector<8xf32> to vector<1x8xf32>
    %cst_16 = arith.constant 8.000000e+00 : f32
    %55 = vector.broadcast %cst_16 : f32 to vector<1x8xf32>
    %56 = arith.divf %54, %55 : vector<1x8xf32>
    %57 = vector.broadcast %56 : vector<1x8xf32> to vector<8x8xf32>
    %58 = arith.subf %51, %57 : vector<8x8xf32>
    %59 = arith.mulf %58, %58 : vector<8x8xf32>
    %cst_17 = arith.constant dense<0.000000e+00> : vector<8xf32>
    %60 = vector.multi_reduction <add>, %59, %cst_17 [0] : vector<8x8xf32> to vector<8xf32>
    %61 = vector.shape_cast %60 : vector<8xf32> to vector<1x8xf32>
    %cst_18 = arith.constant 0.142857149 : f32
    %62 = vector.broadcast %cst_18 : f32 to vector<1x8xf32>
    %63 = arith.mulf %61, %62 : vector<1x8xf32>
    %cst_19 = arith.constant 9.99999993E-9 : f32
    %64 = vector.broadcast %cst_19 : f32 to vector<1x8xf32>
    %65 = arith.addf %63, %64 : vector<1x8xf32>
    %66 = math.rsqrt %65 : vector<1x8xf32>
    %67 = arith.mulf %52, %66 : vector<1x8xf32>
    %68 = vector.broadcast %67 : vector<1x8xf32> to vector<8x8xf32>
    %69 = arith.mulf %58, %68 : vector<8x8xf32>
    %70 = arith.addf %51, %69 : vector<8x8xf32>
    %71 = tpu.transpose %70, [1, 0] : vector<8x8xf32> -> vector<8x8xf32>
    %c48 = arith.constant 48 : index
    %c0_20 = arith.constant 0 : index
    %72 = vector.load %arg1[%c48, %c0_20] : memref<64x32xf32, #tpu.memory_space<vmem>>, vector<8x1xf32>
    %c59 = arith.constant 59 : index
    %c0_21 = arith.constant 0 : index
    %73 = vector.load %arg1[%c59, %c0_21] : memref<64x32xf32, #tpu.memory_space<vmem>>, vector<1x1xf32>
    %74 = vector.broadcast %72 : vector<8x1xf32> to vector<8x8xf32>
    %75 = arith.mulf %71, %74 : vector<8x8xf32>
    %cst_22 = arith.constant dense<0.000000e+00> : vector<8xf32>
    %76 = vector.multi_reduction <add>, %75, %cst_22 [0] : vector<8x8xf32> to vector<8xf32>
    %77 = vector.shape_cast %76 : vector<8xf32> to vector<1x8xf32>
    %78 = vector.broadcast %73 : vector<1x1xf32> to vector<1x8xf32>
    %79 = arith.addf %77, %78 : vector<1x8xf32>
    %c0_23 = arith.constant 0 : index
    %c0_24 = arith.constant 0 : index
    %80 = vector.load %arg2[%c0_23, %c0_24] : memref<1x8xf32, #tpu.memory_space<vmem>>, vector<1x8xf32>
    tpu.vector_store %arg2[%c0_23, %c0_24], %79 {strides = array<i32>} : memref<1x8xf32, #tpu.memory_space<vmem>>, vector<1x8xf32>,
    return
  }
}

</mosaic_0001>

<bundles_post_ra>
// kernel: model_forward_pallas.1
= control target key start
LH: loop header
LB: loop body
LE: loop exit
PB: predicated region body
PF: predicated region fallthrough
CT: control target
= control target key end

     0   :  { %v402_v1 = vmov 3   ;;  %v403_v2 = vmov 5   ;;  %s470_s0 = inlined_call_operand.vmem [shape: f32[8,32], index: 0, kind: input, shape index: {}]   ;;  %s471_s1 = inlined_call_operand.vmem [shape: f32[64,32], index: 1, kind: input, shape index: {}]   ;;  %s472_s2 = inlined_call_operand.hbm [shape: f32[1,8], index: 2, kind: output, shape index: {}]  }
   0x1   :  { %v12_v0 = vld [vmem:[%s470_s0] sm:$0xff]  ;;  %370 = vset.pattern.permute.xlu0 %v402_v1  ;;  %372 = vset.pattern.permute.xlu1 %v403_v2  ;;  %v49_v3 = vld [vmem:[%s471_s1 + $0x18] sm:$0xff] }
   0x2   :  { %7 = vsyncpa [#allocation3], 0  ;;  %19 = vperm.xlu0 %370, %v12_v0   ;;  %31 = vperm.xlu1 %372, %v12_v0   ;;  %v404_v4 = vmov 0.0   ;;  %v48_v5 = vld [vmem:[%s471_s1 + $0x10] sm:$0xff]  ;;  %v405_v6 = vmov 4   ;;  %v406_v7 = vmov 6   ;;  %v13_v10 = vlaneseq }
   0x3   :  { %344 = vmatprep.subr.mxu0 %v404_v4  ;;  %355 = vmatprep.subr.mxu1 %v404_v4  ;;  %v47_v8 = vld [vmem:[%s471_s1 + $0x8] sm:$0xff]  ;;  %vm407_vm0 = vmmov 0   ;;  %v46_v9 = vld [vmem:[%s471_s1] sm:$0xff]  ;;  %vm50_vm11 = vcmask 261120   ;;  %vm125_vm12 = vcmask 130048   ;;  %v408_v50 = vmov 0  }
   0x4   :  { %345 = vmatpush3.msra.mxu0 %v49_v3  ;;  %352 = vmatprep.mubr.msk.f32.mxu0 %vm407_vm0, %v404_v4  ;;  %v14_v11 = vand.u32 127, %v13_v10  ;;  %v155_v19 = vld [vmem:[%s471_s1 + $0x28] sm:$0xff]  ;;  %v154_v20 = vld [vmem:[%s471_s1 + $0x20] sm:$0xff]  ;;  %v149_v42 = vshrl.u32 %v13_v10, 7  ;;  %v124_v43 = vld [vmem:[%s471_s1 + $0x38] sm:$0x1] }
   0x5   :  { %346 = vmatprep.subr.mxu0 %v404_v4  ;;  %359 = vmatprep.mubr.msk.f32.mxu1 %vm407_vm0, %v404_v4  ;;  %v295_v51 = vld [vmem:[%s471_s1 + $0x30] sm:$0xff]  ;;  %v296_v52 = vld [vmem:[%s471_s1 + $0x3b] sm:$0x1]  ;;  %v334_v53 = vld [vmem:[%s471_s1 + $0x3a] ss:$0 sm:$0xff]  ;;  %vm235_vm13 = vcmask 64512  }
   0x6   :  { %371 = vset.pattern.permute.xlu0 %v405_v6  ;;  %373 = vset.pattern.permute.xlu1 %v406_v7  ;;  %v15_v12 = vcvt.s32.f32 %v14_v11  ;;  %v150_v44 = vsub.s32 0, %v149_v42  ;;  %s409_s4 = smov [#allocation2]   ;;  %vm316_vm14 = vcmask 57344  }
   0x7   :  { %25 = vperm.xlu0 %371, %v12_v0   ;;  %37 = vperm.xlu1 %373, %v12_v0   ;;  %s324_s5 = sshll.u32 %s409_s4, 4  ;;  %s325_s5 = int_to_ptr.vmem [resolvable:$true] %s324_s5 }
   0x8   :  { %347 = vmatpush3.msra.mxu0 %v48_v5  ;;  %vm16_vm1 = vcmp.eq.f32.partialorder %v15_v12, 24.0  ;;  %vm42_vm9 = vcmp.lt.f32.partialorder %v15_v12, 3.0  ;;  %356 = vmatpush3.msra.mxu1 %v155_v19  ;;  %s384_s6 = scalar_lea.vmem %s325_s5, 32  ;;  %p385_p1 = scmp.lt.s32.totalorder %s325_s5, %s325_s5 }
   0x9   :  { %348 = vmatprep.subr.mxu0 %v404_v4  ;;  %357 = vmatprep.subr.mxu1 %v404_v4 }
   0xa   :  { %349 = vmatpush3.msra.mxu0 %v47_v8  ;;  %358 = vmatpush3.msra.mxu1 %v154_v20 }
   0xb   :  { %350 = vmatprep.subr.mxu0 %v404_v4  ;;  %374 = vset.pattern.permute.xlu1 %v408_v50 }
   0xc   :  { %351 = vmatpush3.msra.mxu0 %v46_v9  ;;  %375 = vset.pattern.permute.xlu0 %v408_v50 }
   0xd   :  { %299 = vperm.xlu1 %374, %v295_v51   ;;  %312 = vperm.xlu0 %375, %v296_v52  }
  0x7d   :  { %v20_v13 = vpop.permute.xlu0 %19  ;;  %v32_v14 = vpop.permute.xlu1 %31 }
  0x7e   :  { %vm22_vm2 = vcmp.eq.f32.partialorder %v15_v12, %v20_v13  ;;  %vm34_vm6 = vcmp.eq.f32.partialorder %v15_v12, %v32_v14 }
  0x7f   :  { %vm23_vm3 = vmor %vm16_vm1, %vm22_vm2 }
  0x82   :  { %v26_v15 = vpop.permute.xlu0 %25  ;;  %v38_v16 = vpop.permute.xlu1 %37 }
  0x83   :  { %vm28_vm4 = vcmp.eq.f32.partialorder %v15_v12, %v26_v15  ;;  %vm40_vm5 = vcmp.eq.f32.partialorder %v15_v12, %v38_v16  ;;  %v234_v12 = vld [vmem:[%s471_s1 + $0x39] sm:$0x1]  ;;  %s380_s1 = scalar_lea.vmem %s325_s5, 16 }
  0x84   :  { %vm29_vm7 = vmor %vm23_vm3, %vm28_vm4  ;;  %p381_p0 = scmp.ne.s32.totalorder %s325_s5, %s380_s1  ;;  %p386_p2 = scmp.lt.s32.totalorder %s384_s6, %s380_s1 }
  0x85   :  { %vm35_vm8 = vmor %vm29_vm7, %vm34_vm6 }
  0x86   :  { %vm41_vm10 = vmor %vm35_vm8, %vm40_vm5  ;;  %p387_p3 = por %p386_p2, %p385_p1 }
  0x87   :  { %v332_v17 = vsel %vm41_vm10, 1.0, %v404_v4 }
  0x88   :  { %v45_v18 = vsel %vm42_vm9, %v12_v0, %v332_v17  ;;  %p388_p4 = pnand %p387_p3, %p381_p0 }
  0x89   :  { %353 = vmatmul.mubr.msk.f32.vlgmr.msra.gmra.mxu0 %vm50_vm11, %v45_v18  ;;  %v300_v18 = vpop.permute.xlu1 %299 }
 0x149   :  { %v120_v21 = vpop.f32.mrf.mxu0 }
 0x14a   :  { %v126_v22 = vsel %vm125_vm12, %v120_v21, 0.0 }
 0x14b   :  { %v127_v23 = vrot.slane %v126_v22, 4  ;;  %v354_v24 = vpop.f32.mrf.mxu0 }
 0x14d   :  { %v128_v25 = vadd.f32 %v127_v23, %v126_v22 }
 0x14f   :  { %v129_v26 = vrot.slane %v128_v25, 2 }
 0x151   :  { %v130_v27 = vadd.f32 %v129_v26, %v128_v25 }
 0x153   :  { %v131_v28 = vrot.slane %v130_v27, 1 }
 0x155   :  { %v132_v29 = vadd.f32 %v131_v28, %v130_v27  ;;  %v313_v27 = vpop.permute.xlu0 %312 }
 0x157   :  { %v134_v30 = vmul.f32 0.125, %v132_v29 }
 0x159   :  { %v135_v31 = vsub.f32 %v120_v21, %v134_v30 }
 0x15b   :  { %v136_v32 = vmul.f32 %v135_v31, %v135_v31 }
 0x15d   :  { %v137_v33 = vsel %vm125_vm12, %v136_v32, 0.0 }
 0x15e   :  { %v138_v34 = vrot.slane %v137_v33, 4 }
 0x160   :  { %v139_v35 = vadd.f32 %v138_v34, %v137_v33 }
 0x162   :  { %v140_v36 = vrot.slane %v139_v35, 2 }
 0x164   :  { %v141_v37 = vadd.f32 %v140_v36, %v139_v35 }
 0x166   :  { %v142_v38 = vrot.slane %v141_v37, 1 }
 0x168   :  { %v143_v39 = vadd.f32 %v142_v38, %v141_v37 }
 0x16a   :  { %v144_v40 = vmul.f32 0.14285715, %v143_v39 }
 0x16c   :  { %v145_v41 = vadd.f32 1e-08, %v144_v40 }
 0x16e   :  { %376 = vrsqrt.f32 %v145_v41 }
 0x17b   :  { %v377_v45 = vpop.eup %376 }
 0x17c   :  { %v147_v46 = vmul.f32 %v377_v45, %v124_v43 }
 0x17e   :  { %v151_v47 = vrot.slane %v147_v46, %v150_v44 }
 0x180   :  { %v152_v48 = vmul.f32 %v151_v47, %v135_v31 }
 0x182   :  { %v153_v49 = vadd.f32 %v152_v48, %v120_v21 }
 0x184   :  { %360 = vmatmul.mubr.msk.f32.vlgmr.msra.gmra.mxu1 %vm125_vm12, %v153_v49 }
 0x244   :  { %v230_v54 = vpop.f32.mrf.mxu1 }
 0x245   :  { %v231_v55 = vadd.f32 %v334_v53, %v230_v54 }
 0x246   :  { %v361_v56 = vpop.f32.mrf.mxu1 }
 0x247   :  { %v236_v57 = vsel %vm235_vm13, %v231_v55, 0.0 }
 0x248   :  { %v237_v58 = vrot.slane %v236_v57, 4 }
 0x24a   :  { %v238_v59 = vadd.f32 %v237_v58, %v236_v57 }
 0x24c   :  { %v239_v60 = vrot.slane %v238_v59, 2 }
 0x24e   :  { %v240_v61 = vadd.f32 %v239_v60, %v238_v59 }
 0x250   :  { %v241_v62 = vrot.slane %v240_v61, 1 }
 0x252   :  { %v242_v63 = vadd.f32 %v241_v62, %v240_v61 }
 0x254   :  { %v243_v0 = vmul.f32 0.125, %v242_v63 }
 0x256   :  { %v244_v1 = vsub.f32 %v231_v55, %v243_v0 }
 0x258   :  { %v245_v2 = vmul.f32 %v244_v1, %v244_v1 }
 0x25a   :  { %v246_v3 = vsel %vm235_vm13, %v245_v2, 0.0 }
 0x25b   :  { %v247_v4 = vrot.slane %v246_v3, 4 }
 0x25d   :  { %v248_v5 = vadd.f32 %v247_v4, %v246_v3 }
 0x25f   :  { %v249_v6 = vrot.slane %v248_v5, 2 }
 0x261   :  { %v250_v7 = vadd.f32 %v249_v6, %v248_v5 }
 0x263   :  { %v251_v8 = vrot.slane %v250_v7, 1 }
 0x265   :  { %v252_v9 = vadd.f32 %v251_v8, %v250_v7 }
 0x267   :  { %v253_v10 = vmul.f32 0.14285715, %v252_v9 }
 0x269   :  { %v254_v11 = vadd.f32 1e-08, %v253_v10 }
 0x26b   :  { %378 = vrsqrt.f32 %v254_v11 }
 0x278   :  { %v379_v13 = vpop.eup %378 }
 0x279   :  { %v256_v14 = vmul.f32 %v379_v13, %v234_v12 }
 0x27b   :  { %v260_v15 = vrot.slane %v256_v14, %v150_v44 }
 0x27d   :  { %v261_v16 = vmul.f32 %v260_v15, %v244_v1 }
 0x27f   :  { %v262_v17 = vadd.f32 %v261_v16, %v231_v55 }
 0x281   :  { %263 = vxpose.xlu1.b32.start.end [1/1] (short) (narrow) %v262_v17, 8 }
 0x2fd   :  { %v279_v19 = vpop.trf.xlu1 }
 0x2fe   :  { %v302_v20 = vmul.f32 %v300_v18, %v279_v19 }
 0x300   :  { %v303_v21 = vsel %vm235_vm13, %v302_v20, 0.0 }
 0x301   :  { %v304_v22 = vrot.slane %v303_v21, 4 }
 0x303   :  { %v305_v23 = vadd.f32 %v304_v22, %v303_v21 }
 0x305   :  { %v306_v24 = vrot.slane %v305_v23, 2 }
 0x307   :  { %v307_v25 = vadd.f32 %v306_v24, %v305_v23 }
 0x309   :  { %v308_v26 = vrot.slane %v307_v25, 1 }
 0x30b   :  { %v309_v28 = vadd.f32 %v308_v26, %v307_v25 }
 0x30d   :  { %v315_v29 = vadd.f32 %v313_v27, %v309_v28 }
 0x30f   :  { %317 = vst.msk [vmem:[#allocation2] sm:$0x1] %vm316_vm14, %v315_v29 }
 0x310   :  { %391 = shalt.err (!%p388_p4)
}
 0x311   :  { %327 = dma.vmem_to_hbm [thread:$0]  %s325_s5, 16, %s472_s2, [#allocation3]  }
 0x312   :  { %400 = dma.done.wait [#allocation3], 16  }
 0x313   :  { %401 = vsyncadd [#allocation3], 4294967280 }
 0x314   :  { %331 = vsyncpa [#allocation3], 1 }

</bundles_post_ra>
